<compile_context>
chip_gen: v6e
topology: v6e:2x2x1
jax: 0.10.0
libtpu: 0.0.40
codegen_flags: <defaults>
</compile_context>

<pallas_src>
import functools

import jax
import jax.numpy as jnp
from jax.experimental import pallas as pl
from jax.experimental.pallas import tpu as pltpu


def _num_tensorcores():
    """Best-effort TensorCores-per-device (v7x megacore = 2, v5e/v6e = 1)."""
    try:
        kind = jax.devices()[0].device_kind.lower()
    except Exception:
        return 1
    return 2 if "v7" in kind else 1


def _build_kernel(spans, slab_c, n_ctx):
    """spans: tuple of (class_start, class_count) per grid step (all static)."""

    def _dma_plan(count):
        # Static list of (offset_within_span, classes_in_this_copy).
        plan, off = [], 0
        while off < count:
            c = min(slab_c, count - off)
            plan.append((off, c))
            off += c
        return plan

    def _issue_span(slab_ref, out_ref, sems, start, count):
        # Fire every copy of this core's span, THEN wait on all of them, so the
        # DMAs overlap each other (no per-block start->wait serialization).
        # All offsets/sizes are Python ints -> fully static descriptors.
        copies = []
        for j, (off, c) in enumerate(_dma_plan(count)):
            cp = pltpu.make_async_copy(
                slab_ref.at[pl.ds(0, c)],
                out_ref.at[pl.ds(start + off, c), pl.ds(1, n_ctx), :],
                sems.at[j],
            )
            cp.start()
            copies.append(cp)
        for cp in copies:
            cp.wait()

    def kernel(ctx_ref, emb_ref, out_ref, slab_ref, sems):
        # emb_ref is aliased into out_ref and never read/written here: the
        # prefix/suffix token rows simply stay in place.
        del emb_ref
        # Broadcast + dtype-cast the shared context into the VMEM slab once per
        # core (each grid step is one core's worth of classes).  ~1 us of vst
        # work; replaces the wrapper-side HBM materialization entirely.
        slab_ref[...] = jnp.broadcast_to(
            ctx_ref[...].astype(slab_ref.dtype)[None], slab_ref.shape)

        if len(spans) == 1:
            _issue_span(slab_ref, out_ref, sems, spans[0][0], spans[0][1])
        else:
            i = pl.program_id(0)
            for step, (start, count) in enumerate(spans):
                @pl.when(i == step)
                def _(start=start, count=count):
                    _issue_span(slab_ref, out_ref, sems, start, count)

    return kernel


def prompt_learner_forward(ctx, token_embedding, n_ctx, *,
                           target_dma_bytes=2 * 1024 * 1024):
    """prompts = cat([prefix, ctx, suffix], dim=1)  (class_token_position="end").

    ctx             : (n_ctx, ctx_dim)            learnable generic context
    token_embedding : (n_cls, n_total, ctx_dim)   frozen token embedding of the
        tokenized prompts; [:, :1] is token_prefix, [:, 1+n_ctx:] is
        token_suffix (the buffers registered in __init__); rows [:, 1:1+n_ctx]
        are overwritten with ctx.  Donate this buffer (jit donate_argnums /
        persistent prompts buffer) so the output alias is copy-free.
    returns         : (n_cls, n_total, ctx_dim)
    """
    n_cls, n_total, ctx_dim = token_embedding.shape
    assert n_cls >= 1
    assert ctx.ndim == 2 and ctx.shape == (n_ctx, ctx_dim)
    assert 1 + n_ctx <= n_total
    out_dtype = token_embedding.dtype

    # One class span per TensorCore.  v5e/v6e (1 TC): a single span, single
    # grid step, one batch of maximal DMAs.  v7x (2 TCs): two disjoint,
    # statically-sized spans sharded by the "parallel" grid axis.
    num_cores = _num_tensorcores()
    n_spans = num_cores if (num_cores > 1 and n_cls >= num_cores) else 1
    base, rem = divmod(n_cls, n_spans)
    spans, s = [], 0
    for c in range(n_spans):
        cnt = base + (1 if c < rem else 0)
        spans.append((s, cnt))
        s += cnt
    spans = tuple(spans)

    # Size the VMEM slab by bytes, not class count: ~2 MiB per DMA keeps the
    # per-DMA fixed cost negligible while the (single-buffered) slab stays far
    # below every generation's VMEM budget.
    per_class_bytes = n_ctx * ctx_dim * token_embedding.dtype.itemsize
    slab_c = max(1, min(max(cnt for _, cnt in spans),
                        max(1, target_dma_bytes // per_class_bytes)))
    max_copies = max(-(-cnt // slab_c) for _, cnt in spans)  # ceil-div

    kernel = _build_kernel(spans, slab_c, n_ctx)

    return pl.pallas_call(
        kernel,
        out_shape=jax.ShapeDtypeStruct((n_cls, n_total, ctx_dim), out_dtype),
        grid=(len(spans),),
        in_specs=[
            # Raw learnable context; constant block index -> in VMEM, tiny.
            pl.BlockSpec((n_ctx, ctx_dim), lambda i: (0, 0)),
            # Frozen embedding stays in HBM (no auto-DMA); aliased to output.
            pl.BlockSpec(memory_space=pl.ANY),
        ],
        out_specs=pl.BlockSpec(memory_space=pl.ANY),
        scratch_shapes=[
            pltpu.VMEM((slab_c, n_ctx, ctx_dim), out_dtype),
            pltpu.SemaphoreType.DMA((max_copies,)),
        ],
        input_output_aliases={1: 0},  # token_embedding -> prompts
        compiler_params=pltpu.CompilerParams(
            dimension_semantics=("parallel",),
        ),
    )(ctx, token_embedding)


if __name__ == "__main__":
    # Small shapes consistent with the module (real CLIP: n_total=77, ctx_dim=512).
    n_cls = 4      # number of class names
    n_ctx = 8      # cfg.TRAINER.COOP.N_CTX
    ctx_dim = 128  # clip_model.ln_final.weight.shape[0]
    n_total = 32   # tokenized prompt length

    key = jax.random.PRNGKey(0)
    k_ctx, k_emb = jax.random.split(key)
    dtype = jnp.float32

    # nn.init.normal_(ctx_vectors, std=0.02) -- generic (non-CSC) context.
    ctx = 0.02 * jax.random.normal(k_ctx, (n_ctx, ctx_dim), dtype)
    # Stand-in for clip_model.token_embedding(tokenized_prompts).
    token_embedding = jax.random.normal(k_emb, (n_cls, n_total, ctx_dim), dtype)

    # Build the pure-JAX reference BEFORE donating the embedding buffer.
    token_prefix = token_embedding[:, :1, :]          # SOS
    token_suffix = token_embedding[:, 1 + n_ctx:, :]  # class names, EOS, padding
    ctx_expanded = jnp.broadcast_to(ctx[None], (n_cls, n_ctx, ctx_dim))
    ref = jnp.concatenate([token_prefix, ctx_expanded, token_suffix], axis=1)
    ref = jax.block_until_ready(ref)

    # Donation makes input_output_aliases real (no defensive XLA copy).  In a
    # training loop the returned `prompts` is the persistent buffer fed back
    # (and donated) on the next call; prefix/suffix rows are written only once
    # at init by the embedding itself.
    fwd = jax.jit(functools.partial(prompt_learner_forward, n_ctx=n_ctx),
                  donate_argnums=(1,))
    prompts = fwd(ctx, token_embedding)
    prompts = jax.block_until_ready(prompts)

    assert prompts.shape == (n_cls, n_total, ctx_dim), prompts.shape
    assert jnp.allclose(prompts, ref), "mismatch vs reference concat"
    print("KERNEL_OK")
</pallas_src>

<mosaic_0001>
module attributes {stable_mosaic.version = 11 : i64} {
  func.func @kernel(%arg0: i32, %arg1: memref<8x128xf32, #tpu.memory_space<vmem>>, %arg2: memref<4x32x128xf32, #tpu.memory_space<any>>, %arg3: memref<4x32x128xf32, #tpu.memory_space<any>>, %arg4: memref<4x8x128xf32, #tpu.memory_space<vmem>>, %arg5: memref<1x!tpu.dma_semaphore, #tpu.memory_space<semaphore_mem>>) attributes {dimension_semantics = [#tpu.dimension_semantics<parallel>], iteration_bounds = array<i64: 1>, scalar_prefetch = 0 : i64, scratch_operands = 2 : i64, tpu.core_type = #tpu.core_type<tc>, window_params = [{pipeline_mode = #tpu.pipeline_mode<synchronous>, transform_indices = @transform_0, window_bounds = array<i64: 8, 128>}, {}, {}]} {
    %c0 = arith.constant 0 : index
    %c0_0 = arith.constant 0 : index
    %0 = vector.load %arg1[%c0, %c0_0] : memref<8x128xf32, #tpu.memory_space<vmem>>, vector<8x128xf32>
    %1 = vector.shape_cast %0 : vector<8x128xf32> to vector<1x8x128xf32>
    %2 = vector.shape_cast %1 : vector<1x8x128xf32> to vector<1x8x128xf32>
    %3 = vector.broadcast %2 : vector<1x8x128xf32> to vector<4x8x128xf32>
    %c0_1 = arith.constant 0 : index
    %c0_2 = arith.constant 0 : index
    %c0_3 = arith.constant 0 : index
    %4 = vector.load %arg4[%c0_1, %c0_2, %c0_3] : memref<4x8x128xf32, #tpu.memory_space<vmem>>, vector<4x8x128xf32>
    tpu.vector_store %arg4[%c0_1, %c0_2, %c0_3], %3 {strides = array<i32>} : memref<4x8x128xf32, #tpu.memory_space<vmem>>, vector<4x8x128xf32>,
    %c0_i32 = arith.constant 0 : i32
    %c0_i32_4 = arith.constant 0 : i32
    %c0_i32_5 = arith.constant 0 : i32
    %c0_i32_6 = arith.constant 0 : i32
    %5 = tpu.memref_slice %arg4[%c0_i32_4, %c0_i32_5, %c0_i32_6] : memref<4x8x128xf32, #tpu.memory_space<vmem>> -> memref<4x8x128xf32, #tpu.memory_space<vmem>>
    %c0_i32_7 = arith.constant 0 : i32
    %c1_i32 = arith.constant 1 : i32
    %c0_i32_8 = arith.constant 0 : i32
    %6 = tpu.memref_slice %arg3[%c0_i32_7, %c1_i32, %c0_i32_8] : memref<4x32x128xf32, #tpu.memory_space<any>> -> memref<4x8x128xf32, #tpu.memory_space<any>>
    %7 = tpu.memref_slice %arg5[%c0_i32] : memref<1x!tpu.dma_semaphore, #tpu.memory_space<semaphore_mem>> -> memref<1x!tpu.dma_semaphore, #tpu.memory_space<semaphore_mem>>
    %8 = tpu.memref_squeeze %7 : memref<1x!tpu.dma_semaphore, #tpu.memory_space<semaphore_mem>> -> memref<!tpu.dma_semaphore, #tpu.memory_space<semaphore_mem>>
    tpu.enqueue_dma source(%5 : memref<4x8x128xf32, #tpu.memory_space<vmem>>) target(%6 : memref<4x8x128xf32, #tpu.memory_space<any>>) target_semaphore(%8 : memref<!tpu.dma_semaphore, #tpu.memory_space<semaphore_mem>>)
    %c0_i32_9 = arith.constant 0 : i32
    %c0_i32_10 = arith.constant 0 : i32
    %c0_i32_11 = arith.constant 0 : i32
    %c0_i32_12 = arith.constant 0 : i32
    %9 = tpu.memref_slice %arg4[%c0_i32_10, %c0_i32_11, %c0_i32_12] : memref<4x8x128xf32, #tpu.memory_space<vmem>> -> memref<4x8x128xf32, #tpu.memory_space<vmem>>
    %c0_i32_13 = arith.constant 0 : i32
    %c1_i32_14 = arith.constant 1 : i32
    %c0_i32_15 = arith.constant 0 : i32
    %10 = tpu.memref_slice %arg3[%c0_i32_13, %c1_i32_14, %c0_i32_15] : memref<4x32x128xf32, #tpu.memory_space<any>> -> memref<4x8x128xf32, #tpu.memory_space<any>>
    %11 = tpu.memref_slice %arg5[%c0_i32_9] : memref<1x!tpu.dma_semaphore, #tpu.memory_space<semaphore_mem>> -> memref<1x!tpu.dma_semaphore, #tpu.memory_space<semaphore_mem>>
    %12 = tpu.memref_squeeze %11 : memref<1x!tpu.dma_semaphore, #tpu.memory_space<semaphore_mem>> -> memref<!tpu.dma_semaphore, #tpu.memory_space<semaphore_mem>>
    tpu.wait_dma2 semaphore(%12 : memref<!tpu.dma_semaphore, #tpu.memory_space<semaphore_mem>>) src(%9 : memref<4x8x128xf32, #tpu.memory_space<vmem>>) dst(%10 : memref<4x8x128xf32, #tpu.memory_space<any>>)
    return
  }
  func.func @transform_0(%arg0: i32) -> (i32, i32) {
    %c0_i32 = arith.constant 0 : i32
    %c0_i32_0 = arith.constant 0 : i32
    %c0_i32_1 = arith.constant 0 : i32
    return %c0_i32, %c0_i32_0 : i32, i32
  }
}

</mosaic_0001>

<bundles_post_ra>
// kernel: prompt_learner_forward.1
= control target key start
LH: loop header
LB: loop body
LE: loop exit
PB: predicated region body
PF: predicated region fallthrough
CT: control target
= control target key end

     0   :  { %7 = vsyncpa [#allocation5], 0  ;;  %s96_s9 = smov [#allocation4]   ;;  %s122_s0 = inlined_call_operand.hbm [shape: f32[8,128], index: 0, kind: input, shape index: {}]   ;;  %s123_s1 = inlined_call_operand.hbm [shape: f32[4,32,128], index: 1, kind: input, shape index: {}, may-alias: {1,2}]   ;;  %s124_s2 = inlined_call_operand.hbm [shape: f32[4,32,128], index: 2, kind: output, shape index: {}, may-alias: {1,2}]  }
   0x1   :  { %s14_s10 = sshll.u32 %s96_s9, 4  ;;  %s15_s10 = int_to_ptr.vmem [resolvable:$true] %s14_s10 }
   0x2   :  { %s57_s11 = scalar_lea.vmem %s15_s10, 128  ;;  %p62_p1 = scmp.lt.s32.totalorder %s15_s10, %s15_s10 }
   0x3   :  { %p58_p0 = scmp.ne.s32.totalorder %s15_s10, %s57_s11  ;;  %p63_p2 = scmp.lt.s32.totalorder %s57_s11, %s57_s11 }
   0x5   :  { %p64_p3 = por %p63_p2, %p62_p1 }
   0x7   :  { %p65_p4 = pnand %p64_p3, %p58_p0 }
   0x9   :  { %68 = shalt.err (!%p65_p4)
}
   0xa   :  { %17 = dma.hbm_to_vmem [thread:$0]  %s122_s0, 128, %s15_s10, [#allocation5]  }
   0xb   :  { %92 = dma.done.wait [#allocation5], 128  }
   0xc   :  { %93 = vsyncadd [#allocation5], 4294967168  ;;  %s97_s1 = smov [#allocation2]   ;;  %s26_s17 = scalar_lea.hbm %s124_s2, 16  ;;  %v21_v0 = vld [vmem:[#allocation4] sm:$0xff] }
   0xd   :  { %s28_s14 = sshll.u32 %s97_s1, 4  ;;  %22 = vst [vmem:[#allocation2] sm:$0xff] %v21_v0  ;;  %23 = vst [vmem:[#allocation2 + $0x8] sm:$0xff] %v21_v0  ;;  %s29_s14 = int_to_ptr.vmem [resolvable:$true] %s28_s14 }
   0xe   :  { %24 = vst [vmem:[#allocation2 + $0x10] sm:$0xff] %v21_v0  ;;  %25 = vst [vmem:[#allocation2 + $0x18] sm:$0xff] %v21_v0  ;;  %s69_s18 = scalar_lea.vmem %s29_s14, 512  ;;  %p74_p6 = scmp.lt.s32.totalorder %s29_s14, %s29_s14 }
   0xf   :  { %p70_p5 = scmp.ne.s32.totalorder %s29_s14, %s69_s18  ;;  %p75_p7 = scmp.lt.s32.totalorder %s69_s18, %s69_s18 }
  0x11   :  { %p76_p8 = por %p75_p7, %p74_p6 }
  0x13   :  { %p77_p9 = pnand %p76_p8, %p70_p5 }
  0x15   :  { %80 = shalt.err (!%p77_p9)  }
  0x16   :  { %s98_s0 = smov 128   ;;  %s99_s19 = smov 512  }
  0x17   :  { %s100_s20 = smov 8  }
  0x18   :  { %31 = dma.vmem_to_hbm [thread:$0]  %s29_s14, 512, %s26_s17, [#allocation3], %s98_s0, %s99_s19, %s100_s20 }
  0x19   :  { %94 = dma.done.wait [#allocation3], 512 }
  0x1a   :  { %95 = vsyncadd [#allocation3], 4294966784 }
  0x1b   :  { %36 = vsyncpa [#allocation5], 1 }
  0x1c   :  { %37 = vsyncmov [#allocation3] }
  0x1f   :  { %s38_s2 = vpop.sfrf %37 }
  0x20   :  { %p43_p10 = scmp.ne.s32.totalorder %s38_s2, 0 }
  0x22   :  { %42 = shalt.err (%p43_p10)  }

</bundles_post_ra>
